<compile_context>
chip_gen: v5e
topology: v5e:2x2
jax: 0.10.0
libtpu: 0.0.40
codegen_flags: <defaults>
</compile_context>

<pallas_src>
import functools

import jax
import jax.numpy as jnp
from jax.experimental import pallas as pl
from jax.experimental.pallas import tpu as pltpu

_MASK_BIAS = -1e30  # large-negative additive bias instead of -inf (no NaN path)


def _round_up(x, m):
    return ((x + m - 1) // m) * m


def _chip_defaults():
    """Return (vmem_capacity_bytes, mxu_width) with conservative fallbacks."""
    vmem_cap = 64 * 1024 * 1024          # v7x-safe fallback
    mxu_width = 256                      # v6e / v7x MXU width
    try:
        vmem_cap = int(pltpu.get_tpu_info().vmem_capacity_bytes)
    except Exception:
        pass
    try:
        kind = jax.devices()[0].device_kind.lower()
        if any(v in kind for v in ("v2", "v3", "v4", "v5")):
            mxu_width = 128              # 128-wide MXU generations
    except Exception:
        pass
    return vmem_cap, mxu_width


def _vmem_estimate(tb, tn, lp, hp, in_isz, out_isz):
    """Per-grid-step VMEM footprint, including f32 intermediates."""
    x_blk = tb * lp * hp * in_isz
    w_blk = tn * hp * in_isz
    bias_blk = tb * lp * 4
    out_blk = tb * tn * hp * out_isz
    scratch = tb * lp * tn * 4                       # scores scratch (f32)
    live = (tb * lp * tn * 4                         # wide f32 score value
            + 3 * lp * tn * 4                        # per-b softmax temporaries
            + tn * hp * 4                            # f32 accumulator
            + x_blk)                                 # value copy of the x block
    return 2 * (x_blk + w_blk + bias_blk + out_blk) + scratch + live


def _ml_attention_kernel(w_ref, x_ref, bias_ref, o_ref, s_ref, *, tb, lp, hp, tn):
    """One (batch-tile, label-tile) block per grid step.

    w_ref:    (TN, Hp)      weight tile (compute dtype)
    x_ref:    (TB, Lp, Hp)  inputs tile (compute dtype)
    bias_ref: (TB, Lp, 1)   additive mask bias, f32 (0 keep / -1e30 masked)
    o_ref:    (TB, TN, Hp)  output tile
    s_ref:    (TB, Lp, TN)  f32 scores scratch (VMEM)
    """
    w = w_ref[...]                                    # (TN, Hp)
    x_flat = x_ref[...].reshape(tb * lp, hp)          # layout-preserving reshape

    # Fused wide matmul: weight tile stationary in the MXU, all TB*Lp token
    # rows stream through (output width = TN, chosen >= MXU width).
    s = jax.lax.dot_general(
        x_flat, w, (((1,), (1,)), ((), ())),
        preferred_element_type=jnp.float32)           # (TB*Lp, TN) f32

    # Stash scores; (TB*Lp, TN) -> (TB, Lp, TN) is also layout-preserving.
    s_ref[...] = s.reshape(tb, lp, tn)

    def body(b, carry):
        # Additive mask bias (single add, no compare/select, no NaN path).
        sb = s_ref[b] + bias_ref[b]                   # (Lp, TN) f32
        mx = jnp.max(sb, axis=0, keepdims=True)       # (1, TN)
        e = jnp.exp(sb - mx)                          # (Lp, TN)
        den = jnp.sum(e, axis=0, keepdims=True)       # (1, TN)
        # EUP approximate reciprocal (separate VLIW slot) for normalization.
        p = (e * pl.reciprocal(den, approx=True)).astype(x_ref.dtype)
        acc = jax.lax.dot_general(
            p, x_ref[b], (((0,), (0,)), ((), ())),
            preferred_element_type=jnp.float32)       # (TN, Hp) f32
        o_ref[b] = acc.astype(o_ref.dtype)
        return carry

    jax.lax.fori_loop(0, tb, body, None)


def ml_attention(weight, inputs, masks, *,
                 compute_dtype=jnp.bfloat16, out_dtype=None,
                 block_n=None, block_b=None):
    """Label-wise attention.

    weight: (N, H) Linear weight (no bias); inputs: (B, L, H); masks: (B, L)
    with 1/True = keep.  Returns (B, N, H) in `out_dtype` (defaults to
    inputs.dtype; pass jnp.bfloat16 to halve output HBM traffic).
    """
    B, L, H = inputs.shape
    N, H2 = weight.shape
    assert H == H2, (weight.shape, inputs.shape)
    assert masks.shape == (B, L), masks.shape

    out_dtype = inputs.dtype if out_dtype is None else out_dtype
    in_isz = jnp.dtype(compute_dtype).itemsize
    out_isz = jnp.dtype(out_dtype).itemsize

    vmem_cap, mxu_width = _chip_defaults()

    # Lane/sublane-friendly padding targets.
    Hp = _round_up(H, 128)
    Lp = _round_up(L, 128)

    # Label tile: chip-aware (128 on 128-wide-MXU chips, 256 on v6e/v7x).  If
    # the padded label dim is small, keep the whole weight VMEM-resident
    # (single n step -> the weight is DMA'd exactly once).
    Np8 = _round_up(N, 8)
    if block_n is not None:
        TN = min(_round_up(block_n, 8), Np8)
    elif Np8 <= max(2 * mxu_width, 512):
        TN = Np8
    else:
        TN = mxu_width
    Np = _round_up(N, TN)

    # Batch tile: largest TB whose per-step footprint fits ~55% of physical
    # VMEM (headroom for double-buffering + compiler scratch); prefer a TB
    # dividing B so no batch padding pass is needed.
    budget = int(0.55 * vmem_cap)
    if block_b is not None:
        TB = max(1, min(int(block_b), B))
    else:
        TB = 1
        for tb in range(max(1, min(B, 16)), 0, -1):
            if _vmem_estimate(tb, TN, Lp, Hp, in_isz, out_isz) <= budget:
                TB = tb
                break
        if B % TB:
            for tb in range(TB, 0, -1):
                if B % tb == 0:
                    if 2 * tb >= TB:   # accept up to 2x smaller to avoid padding
                        TB = tb
                    break
    Bp = _round_up(B, TB)

    # Pad / cast only when needed (skip extra HBM passes for aligned shapes).
    w_cast = weight.astype(compute_dtype)
    if (Np != N) or (Hp != H):
        w_p = jnp.zeros((Np, Hp), compute_dtype).at[:N, :H].set(w_cast)
    else:
        w_p = w_cast

    x_cast = inputs.astype(compute_dtype)
    if (Bp != B) or (Lp != L) or (Hp != H):
        x_p = jnp.zeros((Bp, Lp, Hp), compute_dtype).at[:B, :L, :H].set(x_cast)
    else:
        x_p = x_cast

    bias = jnp.where(masks.astype(bool), 0.0, _MASK_BIAS).astype(jnp.float32)
    if (Bp != B) or (Lp != L):
        bias_p = jnp.full((Bp, Lp), _MASK_BIAS, jnp.float32).at[:B, :L].set(bias)
    else:
        bias_p = bias
    bias_p = bias_p[:, :, None]                      # (Bp, Lp, 1)

    b_blocks = Bp // TB
    n_blocks = Np // TN

    # Traffic-aware grid order: the operand whose block index is constant over
    # the inner axis is fetched once; the other is re-streamed.
    w_bytes = Np * Hp * in_isz
    x_bytes = Bp * Lp * Hp * in_isz
    traffic_b_outer = x_bytes + w_bytes * (1 if n_blocks == 1 else b_blocks)
    traffic_n_outer = w_bytes + x_bytes * (1 if b_blocks == 1 else n_blocks)

    if traffic_b_outer <= traffic_n_outer:
        grid = (b_blocks, n_blocks)
        w_map = lambda b, n: (n, 0)
        x_map = lambda b, n: (b, 0, 0)
        m_map = lambda b, n: (b, 0, 0)
        o_map = lambda b, n: (b, n, 0)
    else:
        grid = (n_blocks, b_blocks)
        w_map = lambda n, b: (n, 0)
        x_map = lambda n, b: (b, 0, 0)
        m_map = lambda n, b: (b, 0, 0)
        o_map = lambda n, b: (b, n, 0)

    est = _vmem_estimate(TB, TN, Lp, Hp, in_isz, out_isz)
    vmem_limit = int(min(int(0.90 * vmem_cap), max(2 * est, 64 * 1024 * 1024)))
    vmem_limit = max(vmem_limit, 16 * 1024 * 1024)

    kernel = functools.partial(_ml_attention_kernel, tb=TB, lp=Lp, hp=Hp, tn=TN)

    out_p = pl.pallas_call(
        kernel,
        out_shape=jax.ShapeDtypeStruct((Bp, Np, Hp), out_dtype),
        grid_spec=pltpu.PrefetchScalarGridSpec(
            num_scalar_prefetch=0,
            grid=grid,
            in_specs=[
                pl.BlockSpec((TN, Hp), w_map),        # weight tile
                pl.BlockSpec((TB, Lp, Hp), x_map),    # inputs tile
                pl.BlockSpec((TB, Lp, 1), m_map),     # additive mask bias
            ],
            out_specs=pl.BlockSpec((TB, TN, Hp), o_map),
            scratch_shapes=[pltpu.VMEM((TB, Lp, TN), jnp.float32)],
        ),
        compiler_params=pltpu.CompilerParams(
            dimension_semantics=("parallel", "parallel"),
            vmem_limit_bytes=vmem_limit),
    )(w_p, x_p, bias_p)

    if (Bp != B) or (Np != N) or (Hp != H):
        out_p = out_p[:B, :N, :H]
    return out_p


def ml_attention_ref(weight, inputs, masks):
    # Plain-JAX reference matching the PyTorch forward (f32).
    att = jnp.einsum('blh,nh->bln', inputs, weight)           # Linear, no bias
    att = jnp.swapaxes(att, -1, -2)                           # (B, N, L)
    att = jnp.where(masks[:, None, :] > 0, att, -jnp.inf)     # masked_fill(~mask)
    att = jax.nn.softmax(att, axis=-1)
    return jnp.einsum('bnl,blh->bnh', att, inputs)


if __name__ == "__main__":
    B, L, H, N = 2, 8, 32, 4   # batch, seq, hidden_size, num_hidden

    key = jax.random.PRNGKey(0)
    k_w, k_x = jax.random.split(key)

    # nn.init.xavier_uniform_ for a Linear weight of shape (N, H):
    # bound = sqrt(6 / (fan_in + fan_out)) = sqrt(6 / (H + N)).
    bound = (6.0 / (H + N)) ** 0.5
    weight = jax.random.uniform(k_w, (N, H), jnp.float32, minval=-bound, maxval=bound)
    inputs = jax.random.normal(k_x, (B, L, H), jnp.float32)

    # Valid-length style mask: batch 0 fully valid, batch 1 valid for 5 tokens.
    lengths = jnp.array([L, 5], dtype=jnp.int32)
    masks = (jnp.arange(L)[None, :] < lengths[:, None]).astype(jnp.float32)  # (B, L)

    ref = ml_attention_ref(weight, inputs, masks)

    # f32 compute path (tolerance covers the EUP approximate reciprocal).
    out_f32 = jax.block_until_ready(
        ml_attention(weight, inputs, masks, compute_dtype=jnp.float32))
    assert out_f32.shape == (B, N, H)
    assert bool(jnp.allclose(out_f32, ref, atol=2e-2, rtol=2e-2)), (
        "f32 path mismatch, max abs err = %f"
        % float(jnp.max(jnp.abs(out_f32 - ref))))

    # Default bf16-operand path (MXU-native); masking/softmax stay in f32.
    out_bf16 = jax.block_until_ready(ml_attention(weight, inputs, masks))
    assert out_bf16.shape == (B, N, H)
    assert bool(jnp.all(jnp.isfinite(out_bf16)))
    assert bool(jnp.allclose(out_bf16, ref, atol=1e-1, rtol=1e-1)), (
        "bf16 path mismatch, max abs err = %f"
        % float(jnp.max(jnp.abs(out_bf16 - ref))))

    # bf16 output path (halves output HBM traffic / output VMEM buffers).
    out_lp = jax.block_until_ready(
        ml_attention(weight, inputs, masks, out_dtype=jnp.bfloat16))
    assert out_lp.shape == (B, N, H) and out_lp.dtype == jnp.bfloat16
    assert bool(jnp.allclose(out_lp.astype(jnp.float32), ref, atol=1e-1, rtol=1e-1))

    print("KERNEL_OK")
</pallas_src>

<mosaic_0001>
module attributes {stable_mosaic.version = 11 : i64} {
  func.func @_ml_attention_kernel(%arg0: i32, %arg1: i32, %arg2: memref<8x128xf32, #tpu.memory_space<vmem>>, %arg3: memref<2x128x128xf32, #tpu.memory_space<vmem>>, %arg4: memref<2x128x1xf32, #tpu.memory_space<vmem>>, %arg5: memref<2x8x128xf32, #tpu.memory_space<vmem>>, %arg6: memref<2x128x8xf32, #tpu.memory_space<vmem>>) attributes {dimension_semantics = [#tpu.dimension_semantics<parallel>, #tpu.dimension_semantics<parallel>], iteration_bounds = array<i64: 1, 1>, scalar_prefetch = 0 : i64, scratch_operands = 1 : i64, tpu.core_type = #tpu.core_type<tc>, window_params = [{transform_indices = @transform_0, window_bounds = array<i64: 8, 128>}, {transform_indices = @transform_1, window_bounds = array<i64: 2, 128, 128>}, {transform_indices = @transform_2, window_bounds = array<i64: 2, 128, 1>}, {transform_indices = @transform_3, window_bounds = array<i64: 2, 8, 128>}]} {
    %c0 = arith.constant 0 : index
    %c0_0 = arith.constant 0 : index
    %0 = vector.load %arg2[%c0, %c0_0] : memref<8x128xf32, #tpu.memory_space<vmem>>, vector<8x128xf32>
    %c0_1 = arith.constant 0 : index
    %c0_2 = arith.constant 0 : index
    %c0_3 = arith.constant 0 : index
    %1 = vector.load %arg3[%c0_1, %c0_2, %c0_3] : memref<2x128x128xf32, #tpu.memory_space<vmem>>, vector<2x128x128xf32>
    %2 = vector.shape_cast %1 : vector<2x128x128xf32> to vector<256x128xf32>
    %cst = arith.constant dense<0.000000e+00> : vector<256x8xf32>
    %3 = tpu.matmul %2, %0, %cst {dimension_numbers = #tpu.dot_dimension_numbers<[1], [1], [0], [0], [0, 0, 1, 0], [], []>} : vector<256x128xf32>, vector<8x128xf32>, vector<256x8xf32> -> vector<256x8xf32>
    %4 = vector.shape_cast %3 : vector<256x8xf32> to vector<2x128x8xf32>
    %c0_4 = arith.constant 0 : index
    %c0_5 = arith.constant 0 : index
    %c0_6 = arith.constant 0 : index
    %5 = vector.load %arg6[%c0_4, %c0_5, %c0_6] : memref<2x128x8xf32, #tpu.memory_space<vmem>>, vector<2x128x8xf32>
    tpu.vector_store %arg6[%c0_4, %c0_5, %c0_6], %4 {strides = array<i32>} : memref<2x128x8xf32, #tpu.memory_space<vmem>>, vector<2x128x8xf32>,
    %c0_i32 = arith.constant 0 : i32
    %c2_i32 = arith.constant 2 : i32
    %6 = arith.addi %c0_i32, %c2_i32 : i32
    %c1_i32 = arith.constant 1 : i32
    scf.for %arg7 = %c0_i32 to %6 step %c1_i32  : i32 {
      %7 = arith.index_cast %arg7 : i32 to index
      %c0_8 = arith.constant 0 : index
      %c0_9 = arith.constant 0 : index
      %8 = vector.load %arg6[%7, %c0_8, %c0_9] : memref<2x128x8xf32, #tpu.memory_space<vmem>>, vector<1x128x8xf32>
      %9 = vector.shape_cast %8 : vector<1x128x8xf32> to vector<128x8xf32>
      %10 = arith.index_cast %arg7 : i32 to index
      %c0_10 = arith.constant 0 : index
      %c0_11 = arith.constant 0 : index
      %11 = vector.load %arg4[%10, %c0_10, %c0_11] : memref<2x128x1xf32, #tpu.memory_space<vmem>>, vector<1x128x1xf32>
      %12 = vector.shape_cast %11 : vector<1x128x1xf32> to vector<128x1xf32>
      %13 = vector.broadcast %12 : vector<128x1xf32> to vector<128x8xf32>
      %14 = arith.addf %9, %13 : vector<128x8xf32>
      %cst_12 = arith.constant dense<0xFF800000> : vector<8xf32>
      %15 = vector.multi_reduction <maximumf>, %14, %cst_12 [0] : vector<128x8xf32> to vector<8xf32>
      %16 = vector.shape_cast %15 : vector<8xf32> to vector<1x8xf32>
      %17 = vector.broadcast %16 : vector<1x8xf32> to vector<128x8xf32>
      %18 = arith.subf %14, %17 : vector<128x8xf32>
      %19 = math.exp %18 : vector<128x8xf32>
      %cst_13 = arith.constant dense<0.000000e+00> : vector<8xf32>
      %20 = vector.multi_reduction <add>, %19, %cst_13 [0] : vector<128x8xf32> to vector<8xf32>
      %21 = vector.shape_cast %20 : vector<8xf32> to vector<1x8xf32>
      %22 = tpu.reciprocal %21 {approx = true} : vector<1x8xf32> -> vector<1x8xf32>
      %23 = vector.broadcast %22 : vector<1x8xf32> to vector<128x8xf32>
      %24 = arith.mulf %19, %23 : vector<128x8xf32>
      %25 = arith.index_cast %arg7 : i32 to index
      %c0_14 = arith.constant 0 : index
      %c0_15 = arith.constant 0 : index
      %26 = vector.load %arg3[%25, %c0_14, %c0_15] : memref<2x128x128xf32, #tpu.memory_space<vmem>>, vector<1x128x128xf32>
      %27 = vector.shape_cast %26 : vector<1x128x128xf32> to vector<128x128xf32>
      %cst_16 = arith.constant dense<0.000000e+00> : vector<8x128xf32>
      %28 = tpu.matmul %24, %27, %cst_16 {dimension_numbers = #tpu.dot_dimension_numbers<[0], [0], [1], [1], [0, 1, 1, 1], [], []>} : vector<128x8xf32>, vector<128x128xf32>, vector<8x128xf32> -> vector<8x128xf32>
      %29 = arith.index_cast %arg7 : i32 to index
      %c0_17 = arith.constant 0 : index
      %c0_18 = arith.constant 0 : index
      %30 = vector.load %arg5[%29, %c0_17, %c0_18] : memref<2x8x128xf32, #tpu.memory_space<vmem>>, vector<1x8x128xf32>
      %31 = vector.shape_cast %30 : vector<1x8x128xf32> to vector<8x128xf32>
      %32 = vector.shape_cast %28 : vector<8x128xf32> to vector<1x8x128xf32>
      tpu.vector_store %arg5[%29, %c0_17, %c0_18], %32 {strides = array<i32>} : memref<2x8x128xf32, #tpu.memory_space<vmem>>, vector<1x8x128xf32>,
    }
    %c2_i32_7 = arith.constant 2 : i32
    return
  }
  func.func @transform_0(%arg0: i32, %arg1: i32) -> (i32, i32) {
    %c0_i32 = arith.constant 0 : i32
    %c0_i32_0 = arith.constant 0 : i32
    return %arg1, %c0_i32 : i32, i32
  }
  func.func @transform_1(%arg0: i32, %arg1: i32) -> (i32, i32, i32) {
    %c0_i32 = arith.constant 0 : i32
    %c0_i32_0 = arith.constant 0 : i32
    %c0_i32_1 = arith.constant 0 : i32
    return %arg0, %c0_i32, %c0_i32_0 : i32, i32, i32
  }
  func.func @transform_2(%arg0: i32, %arg1: i32) -> (i32, i32, i32) {
    %c0_i32 = arith.constant 0 : i32
    %c0_i32_0 = arith.constant 0 : i32
    %c0_i32_1 = arith.constant 0 : i32
    return %arg0, %c0_i32, %c0_i32_0 : i32, i32, i32
  }
  func.func @transform_3(%arg0: i32, %arg1: i32) -> (i32, i32, i32) {
    %c0_i32 = arith.constant 0 : i32
    %c0_i32_0 = arith.constant 0 : i32
    return %arg0, %arg1, %c0_i32 : i32, i32, i32
  }
}

</mosaic_0001>

<bundles_post_ra>
// kernel: tpu_custom_call.1
= control target key start
LH: loop header
LB: loop body
LE: loop exit
PB: predicated region body
PF: predicated region fallthrough
CT: control target
= control target key end

     0   :  { %8 = vsyncpa [#allocation4], 0  ;;  %s1078_s0 = inlined_call_operand.hbm [shape: f32[8,128], index: 0, kind: input, shape index: {}]   ;;  %s1079_s1 = inlined_call_operand.vmem [shape: f32[2,128,128], index: 1, kind: input, shape index: {}]   ;;  %s1080_s2 = inlined_call_operand.vmem [shape: f32[2,128,1], index: 2, kind: input, shape index: {}]   ;;  %s1081_s3 = inlined_call_operand.hbm [shape: f32[2,8,128], index: 3, kind: output, shape index: {}]  }
   0x1   :  { %9 = vsyncpa [#allocation5], 0  ;;  %s15_s14 = sshll.u32 %s1078_s0, 4  ;;  %s706_s15 = smov [#allocation3]   ;;  %s16_s14 = int_to_ptr.hbm [resolvable:$true] %s15_s14 }
   0x2   :  { %s17_s16 = sshll.u32 %s706_s15, 4  ;;  %s18_s16 = int_to_ptr.vmem [resolvable:$true] %s17_s16 }
   0x3   :  { %20 = dma.hbm_to_vmem [thread:$0]  %s16_s14, 128, %s18_s16, [#allocation4]  }
   0x4   :  { %698 = dma.done.wait [#allocation4], 128  }
   0x5   :  { %699 = vsyncadd [#allocation4], 4294967168  ;;  %v29_v0 = vld [vmem:[#allocation3] sm:$0xff]  ;;  %v47_v5 = vld [vmem:[%s1079_s1 + $0x88] sm:$0xff]  ;;  %vm175_vm0 = vcmask 64512   ;;  %s862_s24 = smov 0  }
   0x6   :  { %591 = vmatpush.xpose.msra.mxu2 %v29_v0  ;;  %592 = vmatpush.xpose.msra.mxu3 %v29_v0  ;;  %v46_v1 = vld [vmem:[%s1079_s1 + $0x80] sm:$0xff]  ;;  %v55_v6 = vld [vmem:[%s1079_s1 + $0xc8] sm:$0xff]  ;;  %v48_v9 = vld [vmem:[%s1079_s1 + $0x90] sm:$0xff] }
   0x7   :  { %v54_v2 = vld [vmem:[%s1079_s1 + $0xc0] sm:$0xff]  ;;  %77 = vmatpush.xpose.msra.mxu0 %v29_v0  ;;  %590 = vmatpush.xpose.msra.mxu1 %v29_v0  ;;  %v31_v7 = vld [vmem:[%s1079_s1 + $0x8] sm:$0xff]  ;;  %v56_v10 = vld [vmem:[%s1079_s1 + $0xd0] sm:$0xff] }
   0x8   :  { %v30_v3 = vld [vmem:[%s1079_s1] sm:$0xff]  ;;  %v39_v8 = vld [vmem:[%s1079_s1 + $0x48] sm:$0xff]  ;;  %v32_v11 = vld [vmem:[%s1079_s1 + $0x10] sm:$0xff] }
   0x9   :  { %v38_v4 = vld [vmem:[%s1079_s1 + $0x40] sm:$0xff]  ;;  %126 = vmatmul.f32.vlgmr.msra.gmra.mxu2 %v46_v1  ;;  %150 = vmatmul.f32.vlgmr.msra.gmra.mxu3 %v54_v2  ;;  %v40_v12 = vld [vmem:[%s1079_s1 + $0x50] sm:$0xff]  ;;  %v49_v13 = vld [vmem:[%s1079_s1 + $0x98] sm:$0xff] }
   0xa   :  { %78 = vmatmul.f32.vlgmr.msra.gmra.mxu0 %v30_v3  ;;  %102 = vmatmul.f32.vlgmr.msra.gmra.mxu1 %v38_v4  ;;  %v57_v14 = vld [vmem:[%s1079_s1 + $0xd8] sm:$0xff]  ;;  %v50_v17 = vld [vmem:[%s1079_s1 + $0xa0] sm:$0xff]  ;;  %v51_v21 = vld [vmem:[%s1079_s1 + $0xa8] sm:$0xff] }
   0xb   :  { %v33_v15 = vld [vmem:[%s1079_s1 + $0x18] sm:$0xff]  ;;  %v58_v18 = vld [vmem:[%s1079_s1 + $0xe0] sm:$0xff]  ;;  %v59_v22 = vld [vmem:[%s1079_s1 + $0xe8] sm:$0xff] }
   0xc   :  { %v41_v16 = vld [vmem:[%s1079_s1 + $0x58] sm:$0xff]  ;;  %v34_v19 = vld [vmem:[%s1079_s1 + $0x20] sm:$0xff]  ;;  %v35_v23 = vld [vmem:[%s1079_s1 + $0x28] sm:$0xff] }
   0xd   :  { %v42_v20 = vld [vmem:[%s1079_s1 + $0x60] sm:$0xff]  ;;  %v43_v24 = vld [vmem:[%s1079_s1 + $0x68] sm:$0xff]  ;;  %v52_v25 = vld [vmem:[%s1079_s1 + $0xb0] sm:$0xff] }
   0xe   :  { %v60_v26 = vld [vmem:[%s1079_s1 + $0xf0] sm:$0xff]  ;;  %v53_v29 = vld [vmem:[%s1079_s1 + $0xb8] sm:$0xff] }
   0xf   :  { %v36_v27 = vld [vmem:[%s1079_s1 + $0x30] sm:$0xff]  ;;  %v61_v30 = vld [vmem:[%s1079_s1 + $0xf8] sm:$0xff] }
  0x10   :  { %v44_v28 = vld [vmem:[%s1079_s1 + $0x70] sm:$0xff]  ;;  %v37_v31 = vld [vmem:[%s1079_s1 + $0x38] sm:$0xff] }
  0x11   :  { %129 = vmatmul.f32.gmra.mxu2 %v47_v5  ;;  %153 = vmatmul.f32.gmra.mxu3 %v55_v6  ;;  %v45_v32 = vld [vmem:[%s1079_s1 + $0x78] sm:$0xff] }
  0x12   :  { %81 = vmatmul.f32.gmra.mxu0 %v31_v7  ;;  %105 = vmatmul.f32.gmra.mxu1 %v39_v8 }
  0x19   :  { %132 = vmatmul.f32.gmra.mxu2 %v48_v9  ;;  %156 = vmatmul.f32.gmra.mxu3 %v56_v10 }
  0x1a   :  { %84 = vmatmul.f32.gmra.mxu0 %v32_v11  ;;  %108 = vmatmul.f32.gmra.mxu1 %v40_v12 }
  0x21   :  { %135 = vmatmul.f32.gmra.mxu2 %v49_v13  ;;  %159 = vmatmul.f32.gmra.mxu3 %v57_v14 }
  0x22   :  { %87 = vmatmul.f32.gmra.mxu0 %v33_v15  ;;  %111 = vmatmul.f32.gmra.mxu1 %v41_v16 }
  0x29   :  { %138 = vmatmul.f32.gmra.mxu2 %v50_v17  ;;  %162 = vmatmul.f32.gmra.mxu3 %v58_v18 }
  0x2a   :  { %90 = vmatmul.f32.gmra.mxu0 %v34_v19  ;;  %114 = vmatmul.f32.gmra.mxu1 %v42_v20 }
  0x31   :  { %141 = vmatmul.f32.gmra.mxu2 %v51_v21  ;;  %165 = vmatmul.f32.gmra.mxu3 %v59_v22 }
  0x32   :  { %93 = vmatmul.f32.gmra.mxu0 %v35_v23  ;;  %117 = vmatmul.f32.gmra.mxu1 %v43_v24 }
  0x39   :  { %144 = vmatmul.f32.gmra.mxu2 %v52_v25  ;;  %168 = vmatmul.f32.gmra.mxu3 %v60_v26 }
  0x3a   :  { %96 = vmatmul.f32.gmra.mxu0 %v36_v27  ;;  %120 = vmatmul.f32.gmra.mxu1 %v44_v28 }
  0x41   :  { %147 = vmatmul.f32.gmra.mxu2 %v53_v29  ;;  %171 = vmatmul.f32.gmra.mxu3 %v61_v30 }
  0x42   :  { %99 = vmatmul.f32.gmra.mxu0 %v37_v31  ;;  %123 = vmatmul.f32.gmra.mxu1 %v45_v32 }
  0x87   :  { %v79_v33 = vpop.f32.mrf.mxu0  ;;  %v103_v34 = vpop.f32.mrf.mxu1 }
  0x88   :  { %176 = vst.msk [vmem:[#allocation2] sm:$0xff] %vm175_vm0, %v79_v33 }
  0x89   :  { %184 = vst.msk [vmem:[#allocation2 + $0x40] sm:$0xff] %vm175_vm0, %v103_v34 }
  0x8c   :  { %v127_v35 = vpop.f32.mrf.mxu2  ;;  %v151_v36 = vpop.f32.mrf.mxu3 }
  0x8d   :  { %192 = vst.msk [vmem:[#allocation2 + $0x80] sm:$0xff] %vm175_vm0, %v127_v35 }
  0x8e   :  { %200 = vst.msk [vmem:[#allocation2 + $0xc0] sm:$0xff] %vm175_vm0, %v151_v36 }
  0x8f   :  { %v82_v37 = vpop.f32.mrf.mxu0  ;;  %v106_v38 = vpop.f32.mrf.mxu1 }
  0x90   :  { %177 = vst.msk [vmem:[#allocation2 + $0x8] sm:$0xff] %vm175_vm0, %v82_v37 }
  0x91   :  { %185 = vst.msk [vmem:[#allocation2 + $0x48] sm:$0xff] %vm175_vm0, %v106_v38 }
  0x94   :  { %v130_v39 = vpop.f32.mrf.mxu2  ;;  %v154_v40 = vpop.f32.mrf.mxu3 }
  0x95   :  { %193 = vst.msk [vmem:[#allocation2 + $0x88] sm:$0xff] %vm175_vm0, %v130_v39 }
  0x96   :  { %201 = vst.msk [vmem:[#allocation2 + $0xc8] sm:$0xff] %vm175_vm0, %v154_v40 }
  0x97   :  { %v85_v41 = vpop.f32.mrf.mxu0  ;;  %v109_v42 = vpop.f32.mrf.mxu1 }
  0x98   :  { %178 = vst.msk [vmem:[#allocation2 + $0x10] sm:$0xff] %vm175_vm0, %v85_v41 }
  0x99   :  { %186 = vst.msk [vmem:[#allocation2 + $0x50] sm:$0xff] %vm175_vm0, %v109_v42 }
  0x9c   :  { %v133_v43 = vpop.f32.mrf.mxu2  ;;  %v157_v44 = vpop.f32.mrf.mxu3 }
  0x9d   :  { %194 = vst.msk [vmem:[#allocation2 + $0x90] sm:$0xff] %vm175_vm0, %v133_v43 }
  0x9e   :  { %202 = vst.msk [vmem:[#allocation2 + $0xd0] sm:$0xff] %vm175_vm0, %v157_v44 }
  0x9f   :  { %v88_v45 = vpop.f32.mrf.mxu0  ;;  %v112_v46 = vpop.f32.mrf.mxu1 }
  0xa0   :  { %179 = vst.msk [vmem:[#allocation2 + $0x18] sm:$0xff] %vm175_vm0, %v88_v45 }
  0xa1   :  { %187 = vst.msk [vmem:[#allocation2 + $0x58] sm:$0xff] %vm175_vm0, %v112_v46 }
  0xa4   :  { %v136_v47 = vpop.f32.mrf.mxu2  ;;  %v160_v48 = vpop.f32.mrf.mxu3 }
  0xa5   :  { %195 = vst.msk [vmem:[#allocation2 + $0x98] sm:$0xff] %vm175_vm0, %v136_v47 }
  0xa6   :  { %203 = vst.msk [vmem:[#allocation2 + $0xd8] sm:$0xff] %vm175_vm0, %v160_v48 }
  0xa7   :  { %v91_v49 = vpop.f32.mrf.mxu0  ;;  %v115_v50 = vpop.f32.mrf.mxu1 }
  0xa8   :  { %180 = vst.msk [vmem:[#allocation2 + $0x20] sm:$0xff] %vm175_vm0, %v91_v49 }
  0xa9   :  { %188 = vst.msk [vmem:[#allocation2 + $0x60] sm:$0xff] %vm175_vm0, %v115_v50 }
  0xac   :  { %v139_v51 = vpop.f32.mrf.mxu2  ;;  %v163_v52 = vpop.f32.mrf.mxu3 }
  0xad   :  { %196 = vst.msk [vmem:[#allocation2 + $0xa0] sm:$0xff] %vm175_vm0, %v139_v51 }
  0xae   :  { %204 = vst.msk [vmem:[#allocation2 + $0xe0] sm:$0xff] %vm175_vm0, %v163_v52 }
  0xaf   :  { %v94_v53 = vpop.f32.mrf.mxu0  ;;  %v118_v54 = vpop.f32.mrf.mxu1 }
  0xb0   :  { %181 = vst.msk [vmem:[#allocation2 + $0x28] sm:$0xff] %vm175_vm0, %v94_v53 }
  0xb1   :  { %189 = vst.msk [vmem:[#allocation2 + $0x68] sm:$0xff] %vm175_vm0, %v118_v54 }
  0xb4   :  { %v142_v55 = vpop.f32.mrf.mxu2  ;;  %v166_v56 = vpop.f32.mrf.mxu3 }
  0xb5   :  { %197 = vst.msk [vmem:[#allocation2 + $0xa8] sm:$0xff] %vm175_vm0, %v142_v55 }
  0xb6   :  { %205 = vst.msk [vmem:[#allocation2 + $0xe8] sm:$0xff] %vm175_vm0, %v166_v56 }
  0xb7   :  { %v97_v57 = vpop.f32.mrf.mxu0  ;;  %v121_v58 = vpop.f32.mrf.mxu1 }
  0xb8   :  { %182 = vst.msk [vmem:[#allocation2 + $0x30] sm:$0xff] %vm175_vm0, %v97_v57 }
  0xb9   :  { %190 = vst.msk [vmem:[#allocation2 + $0x70] sm:$0xff] %vm175_vm0, %v121_v58 }
  0xbc   :  { %v145_v59 = vpop.f32.mrf.mxu2  ;;  %v169_v60 = vpop.f32.mrf.mxu3 }
  0xbd   :  { %198 = vst.msk [vmem:[#allocation2 + $0xb0] sm:$0xff] %vm175_vm0, %v145_v59 }
  0xbe   :  { %206 = vst.msk [vmem:[#allocation2 + $0xf0] sm:$0xff] %vm175_vm0, %v169_v60 }
  0xbf   :  { %v100_v61 = vpop.f32.mrf.mxu0  ;;  %v124_v62 = vpop.f32.mrf.mxu1 }
  0xc0   :  { %183 = vst.msk [vmem:[#allocation2 + $0x38] sm:$0xff] %vm175_vm0, %v100_v61 }
  0xc1   :  { %191 = vst.msk [vmem:[#allocation2 + $0x78] sm:$0xff] %vm175_vm0, %v124_v62 }
  0xc4   :  { %v148_v63 = vpop.f32.mrf.mxu2  ;;  %v172_v0 = vpop.f32.mrf.mxu3 }
  0xc5   :  { %199 = vst.msk [vmem:[#allocation2 + $0xb8] sm:$0xff] %vm175_vm0, %v148_v63 }
  0xc6   :  { %207 = vst.msk [vmem:[#allocation2 + $0xf8] sm:$0xff] %vm175_vm0, %v172_v0 }
  0xc7 LB: > { %v707_v1 = vmov 0   ;;  %s868_s25 = sshll.u32 %s704_s24, 7  ;;  %s589_s6 = sshll.u32 %s704_s24, 3  ;;  %s704_s24 = sphi %s862_s24, %s213_s24  }
  0xc8   : > { %611 = vset.pattern.permute.xlu2 %v707_v1  ;;  %610 = vset.pattern.permute.xlu1 %v707_v1  ;;  %s874_s28 = scalar_lea.vmem %s1080_s2, %s868_s25  ;;  %s893_s29 = scalar_lea.vmem [#allocation2], %s868_s25 }
  0xc9   : > { %609 = vset.pattern.permute.xlu0 %v707_v1  ;;  %v237_v2 = vld [vmem:[%s874_s28 + $0x20] sm:$0xff]  ;;  %v235_v3 = vld [vmem:[%s874_s28 + $0x10] sm:$0xff]  ;;  %v238_v5 = vld [vmem:[%s874_s28 + $0x28] sm:$0xff]  ;;  %s1053_s5 = scalar_lea.vmem %s1079_s1, %s868_s25  ;;  %s554_s7 = scalar_lea.vmem [#allocation6], %s589_s6 }
  0xca   : > { %v233_v4 = vld [vmem:[%s874_s28] sm:$0xff]  ;;  %271 = vperm.xlu2 %611, %v237_v2   ;;  %261 = vperm.xlu1 %610, %v235_v3   ;;  %v236_v6 = vld [vmem:[%s874_s28 + $0x18] sm:$0xff]  ;;  %v234_v7 = vld [vmem:[%s874_s28 + $0x8] sm:$0xff]  ;;  %s213_s24 = sadd.s32 1, %s704_s24  }
  0xcb   : > { %251 = vperm.xlu0 %609, %v233_v4   ;;  %v241_v8 = vld [vmem:[%s874_s28 + $0x40] sm:$0xff]  ;;  %v240_v9 = vld [vmem:[%s874_s28 + $0x38] sm:$0xff]  ;;  %v239_v10 = vld [vmem:[%s874_s28 + $0x30] sm:$0xff]  ;;  %p210_p0 = scmp.ge.s32.totalorder %s213_s24, 2  }
  0xcc   : > { %v244_v11 = vld [vmem:[%s874_s28 + $0x58] sm:$0xff]  ;;  %v243_v12 = vld [vmem:[%s874_s28 + $0x50] sm:$0xff]  ;;  %v242_v13 = vld [vmem:[%s874_s28 + $0x48] sm:$0xff]  ;;  %s562_s10 = sshll.u32 (%p210_p0), %s1081_s3, 4  ;;  %s708_s11 = smov (%p210_p0), [#allocation6]   ;;  %s563_s10 = int_to_ptr.hbm [resolvable:$true] %s562_s10 }
  0xcd   : > { %v247_v14 = vld [vmem:[%s874_s28 + $0x70] sm:$0xff]  ;;  %v246_v15 = vld [vmem:[%s874_s28 + $0x68] sm:$0xff]  ;;  %v245_v16 = vld [vmem:[%s874_s28 + $0x60] sm:$0xff]  ;;  %s560_s12 = sshll.u32 (%p210_p0), %s708_s11, 4  ;;  %s709_s13 = smov (%p210_p0), 128   ;;  %s561_s12 = int_to_ptr.vmem [resolvable:$true] %s560_s12 }
  0xce   : > { %v248_v17 = vld [vmem:[%s874_s28 + $0x78] sm:$0xff]  ;;  %v220_v29 = vld [vmem:[%s893_s29 + $0x20] sm:$0xff]  ;;  %v221_v32 = vld [vmem:[%s893_s29 + $0x28] sm:$0xff]  ;;  %s710_s14 = smov (%p210_p0), 8  }
  0xcf   : > { %v216_v31 = vld [vmem:[%s893_s29] sm:$0xff]  ;;  %v217_v33 = vld [vmem:[%s893_s29 + $0x8] sm:$0xff]  ;;  %v223_v35 = vld [vmem:[%s893_s29 + $0x38] sm:$0xff] }
  0xd0   : > { %v222_v36 = vld [vmem:[%s893_s29 + $0x30] sm:$0xff]  ;;  %v224_v37 = vld [vmem:[%s893_s29 + $0x40] sm:$0xff]  ;;  %v219_v41 = vld [vmem:[%s893_s29 + $0x18] sm:$0xff] }
  0xd1   : > { %v218_v38 = vld [vmem:[%s893_s29 + $0x10] sm:$0xff]  ;;  %v225_v44 = vld [vmem:[%s893_s29 + $0x48] sm:$0xff]  ;;  %v228_v53 = vld [vmem:[%s893_s29 + $0x60] sm:$0xff] }
  0xd2   : > { %276 = vperm.xlu2 %611, %v238_v5   ;;  %266 = vperm.xlu1 %610, %v236_v6   ;;  %v226_v43 = vld [vmem:[%s893_s29 + $0x50] sm:$0xff]  ;;  %v229_v51 = vld [vmem:[%s893_s29 + $0x68] sm:$0xff]  ;;  %v227_v54 = vld [vmem:[%s893_s29 + $0x58] sm:$0xff] }
  0xd3   : > { %256 = vperm.xlu0 %609, %v234_v7   ;;  %v230_v5 = vld [vmem:[%s893_s29 + $0x70] sm:$0xff] }
  0xda   : > { %291 = vperm.xlu2 %611, %v241_v8   ;;  %286 = vperm.xlu1 %610, %v240_v9  }
  0xdb   : > { %281 = vperm.xlu0 %609, %v239_v10  }
  0xe2   : > { %306 = vperm.xlu2 %611, %v244_v11   ;;  %301 = vperm.xlu1 %610, %v243_v12  }
  0xe3   : > { %296 = vperm.xlu0 %609, %v242_v13   ;;  %v231_v13 = vld [vmem:[%s893_s29 + $0x78] sm:$0xff] }
  0xea   : > { %321 = vperm.xlu2 %611, %v247_v14   ;;  %316 = vperm.xlu1 %610, %v246_v15  }
  0xeb   : > { %311 = vperm.xlu0 %609, %v245_v16  }
  0xf3   : > { %326 = vperm.xlu0 %609, %v248_v17  }
 0x124   : > { %v272_v18 = vpop.permute.xlu2 %271 }
 0x125   : > { %v899_v34 = vadd.f32 %v272_v18, %v220_v29 }
 0x127   : > { %v349_v47 = vsel %vm175_vm0, %v899_v34, -inf }
 0x12c   : > { %v277_v21 = vpop.permute.xlu2 %276 }
 0x12d   : > { %v907_v40 = vadd.f32 %v277_v21, %v221_v32 }
 0x12f   : > { %v351_v59 = vsel %vm175_vm0, %v907_v40, -inf }
 0x134   : > { %v292_v25 = vpop.permute.xlu2 %291 }
 0x135   : > { %v920_v48 = vadd.f32 %v292_v25, %v224_v37 }
 0x137   : > { %v357_v1 = vsel %vm175_vm0, %v920_v48, -inf }
 0x13c   : > { %v262_v19 = vpop.permute.xlu1 %261  ;;  %v307_v30 = vpop.permute.xlu2 %306 }
 0x13d   : > { %v252_v20 = vpop.permute.xlu0 %251  ;;  %v331_v49 = vadd.f32 %v262_v19, %v218_v38  ;;  %v945_v2 = vadd.f32 %v307_v30, %v227_v54 }
 0x13e   : > { %v905_v39 = vadd.f32 %v252_v20, %v216_v31 }
 0x13f   : > { %v347_v6 = vsel %vm175_vm0, %v331_v49, -inf  ;;  %v363_v21 = vsel %vm175_vm0, %v945_v2, -inf }
 0x140   : > { %v345_v55 = vsel %vm175_vm0, %v905_v39, -inf }
 0x141   : > { %v350_v3 = vmax.f32 %v345_v55, %v349_v47 }
 0x143   : > { %v358_v19 = vmax.f32 %v350_v3, %v357_v1 }
 0x144   : > { %v267_v22 = vpop.permute.xlu1 %266  ;;  %v322_v4 = vpop.permute.xlu2 %321 }
 0x145   : > { %v257_v23 = vpop.permute.xlu0 %256  ;;  %v332_v56 = vadd.f32 %v267_v22, %v219_v41  ;;  %v955_v14 = vadd.f32 %v322_v4, %v230_v5 }
 0x146   : > { %v910_v42 = vadd.f32 %v257_v23, %v217_v33 }
 0x147   : > { %v348_v7 = vsel %vm175_vm0, %v332_v56, -inf }
 0x148   : > { %v346_v60 = vsel %vm175_vm0, %v910_v42, -inf }
 0x149   : > { %v352_v10 = vmax.f32 %v346_v60, %v351_v59 }
 0x14c   : > { %v287_v24 = vpop.permute.xlu1 %286 }
 0x14d   : > { %v282_v26 = vpop.permute.xlu0 %281  ;;  %v914_v45 = vadd.f32 %v287_v24, %v223_v35 }
 0x14e   : > { %v916_v46 = vadd.f32 %v282_v26, %v222_v36  ;;  %v369_v26 = vsel %vm175_vm0, %v955_v14, -inf }
 0x14f   : > { %v355_v61 = vsel %vm175_vm0, %v914_v45, -inf }
 0x150   : > { %v353_v62 = vsel %vm175_vm0, %v916_v46, -inf  ;;  %v356_v11 = vmax.f32 %v348_v7, %v355_v61 }
 0x151   : > { %v354_v12 = vmax.f32 %v347_v6, %v353_v62 }
 0x152   : > { %v364_v25 = vmax.f32 %v356_v11, %v363_v21 }
 0x154   : > { %v302_v27 = vpop.permute.xlu1 %301 }
 0x155   : > { %v297_v28 = vpop.permute.xlu0 %296  ;;  %v927_v57 = vadd.f32 %v302_v27, %v226_v43 }
 0x156   : > { %v929_v58 = vadd.f32 %v297_v28, %v225_v44 }
 0x157   : > { %v361_v8 = vsel %vm175_vm0, %v927_v57, -inf }
 0x158   : > { %v359_v9 = vsel %vm175_vm0, %v929_v58, -inf  ;;  %v362_v17 = vmax.f32 %v354_v12, %v361_v8 }
 0x159   : > { %v360_v18 = vmax.f32 %v352_v10, %v359_v9 }
 0x15a   : > { %v370_v28 = vmax.f32 %v362_v17, %v369_v26 }
 0x15c   : > { %v317_v50 = vpop.permute.xlu1 %316 }
 0x15d   : > { %v312_v52 = vpop.permute.xlu0 %311  ;;  %v939_v63 = vadd.f32 %v317_v50, %v229_v51 }
 0x15e   : > { %v941_v0 = vadd.f32 %v312_v52, %v228_v53 }
 0x15f   : > { %v367_v15 = vsel %vm175_vm0, %v939_v63, -inf }
 0x160   : > { %v365_v16 = vsel %vm175_vm0, %v941_v0, -inf  ;;  %v368_v23 = vmax.f32 %v360_v18, %v367_v15 }
 0x161   : > { %v366_v24 = vmax.f32 %v358_v19, %v365_v16 }
 0x163   : > { %v373_v30 = vmax.f32 %v366_v24, %v368_v23 }
 0x165   : > { %v327_v20 = vpop.permute.xlu0 %326 }
 0x166   : > { %v963_v22 = vadd.f32 %v327_v20, %v231_v13 }
 0x168   : > { %v371_v27 = vsel %vm175_vm0, %v963_v22, -inf }
 0x169   : > { %v372_v29 = vmax.f32 %v364_v25, %v371_v27 }
 0x16b   : > { %v374_v31 = vmax.f32 %v370_v28, %v372_v29 }
 0x16d   : > { %v375_v32 = vmax.f32 %v373_v30, %v374_v31 }
 0x16f   : > { %v376_v33 = vrot.slane %v375_v32, 4 }
 0x171   : > { %v377_v35 = vmax.f32 %v375_v32, %v376_v33 }
 0x173   : > { %v378_v36 = vrot.slane %v377_v35, 2 }
 0x175   : > { %v379_v37 = vmax.f32 %v377_v35, %v378_v36 }
 0x177   : > { %v380_v38 = vrot.slane %v379_v37, 1 }
 0x179   : > { %v969_v41 = vmax.f32 %v379_v37, %v380_v38 }
 0x17b   : > { %v382_v43 = vsub.f32 %v905_v39, %v969_v41  ;;  %v383_v44 = vsub.f32 %v910_v42, %v969_v41  ;;  %v384_v47 = vsub.f32 %v331_v49, %v969_v41  ;;  %v385_v50 = vsub.f32 %v332_v56, %v969_v41 }
 0x17c   : > { %v386_v51 = vsub.f32 %v899_v34, %v969_v41  ;;  %v387_v54 = vsub.f32 %v907_v40, %v969_v41  ;;  %v388_v39 = vsub.f32 %v916_v46, %v969_v41  ;;  %v389_v49 = vsub.f32 %v914_v45, %v969_v41 }
 0x17d   : > { %v398_v52 = vmul.f32 1.442695, %v382_v43  ;;  %v400_v53 = vmul.f32 1.442695, %v383_v44  ;;  %v402_v55 = vmul.f32 1.442695, %v384_v47  ;;  %v390_v34 = vsub.f32 %v920_v48, %v969_v41 }
 0x17e   : > { %v404_v59 = vmul.f32 1.442695, %v385_v50  ;;  %v406_v42 = vmul.f32 1.442695, %v386_v51  ;;  %v408_v56 = vmul.f32 1.442695, %v387_v54  ;;  %v391_v46 = vsub.f32 %v929_v58, %v969_v41 }
 0x17f   : > { %612 = vpow2.f32 %v398_v52  ;;  %v410_v60 = vmul.f32 1.442695, %v388_v39  ;;  %v412_v62 = vmul.f32 1.442695, %v389_v49  ;;  %v392_v4 = vsub.f32 %v927_v57, %v969_v41 }
 0x180   : > { %614 = vpow2.f32 %v400_v53  ;;  %v414_v5 = vmul.f32 1.442695, %v390_v34  ;;  %v393_v8 = vsub.f32 %v945_v2, %v969_v41  ;;  %v416_v9 = vmul.f32 1.442695, %v391_v46 }
 0x181   : > { %616 = vpow2.f32 %v402_v55  ;;  %v394_v57 = vsub.f32 %v941_v0, %v969_v41  ;;  %v418_v13 = vmul.f32 1.442695, %v392_v4  ;;  %v395_v2 = vsub.f32 %v939_v63, %v969_v41 }
 0x182   : > { %618 = vpow2.f32 %v404_v59  ;;  %v420_v18 = vmul.f32 1.442695, %v393_v8  ;;  %v396_v0 = vsub.f32 %v955_v14, %v969_v41  ;;  %v397_v63 = vsub.f32 %v963_v22, %v969_v41 }
 0x183   : > { %620 = vpow2.f32 %v406_v42  ;;  %v422_v23 = vmul.f32 1.442695, %v394_v57  ;;  %v424_v27 = vmul.f32 1.442695, %v395_v2 }
 0x184   : > { %622 = vpow2.f32 %v408_v56  ;;  %v426_v31 = vmul.f32 1.442695, %v396_v0  ;;  %v428_v35 = vmul.f32 1.442695, %v397_v63  ;;  %v489_v63 = vld [vmem:[%s1053_s5 + $0x20] sm:$0xff] }
 0x185   : > { %v987_v40 = vpop.eup %612  ;;  %624 = vpow2.f32 %v410_v60 }
 0x186   : > { %v989_v61 = vpop.eup %614  ;;  %v430_v1 = vsel %vm175_vm0, %v987_v40, 0.0  ;;  %626 = vpow2.f32 %v412_v62 }
 0x187   : > { %v995_v45 = vpop.eup %616  ;;  %v431_v3 = vsel %vm175_vm0, %v989_v61, 0.0  ;;  %628 = vpow2.f32 %v414_v5 }
 0x188   : > { %v999_v48 = vpop.eup %618  ;;  %v432_v6 = vadd.f32 %v431_v3, %v430_v1  ;;  %v433_v58 = vsel %vm175_vm0, %v995_v45, 0.0  ;;  %630 = vpow2.f32 %v416_v9 }
 0x189   : > { %v1005_v7 = vpop.eup %620  ;;  %v435_v11 = vsel %vm175_vm0, %v999_v48, 0.0  ;;  %632 = vpow2.f32 %v418_v13 }
 0x18a   : > { %v434_v10 = vadd.f32 %v433_v58, %v432_v6  ;;  %v1011_v12 = vpop.eup %622  ;;  %v437_v16 = vsel %vm175_vm0, %v1005_v7, 0.0  ;;  %634 = vpow2.f32 %v420_v18 }
 0x18b   : > { %v1017_v17 = vpop.eup %624  ;;  %v439_v20 = vsel %vm175_vm0, %v1011_v12, 0.0  ;;  %636 = vpow2.f32 %v422_v23  ;;  %v493_v23 = vld [vmem:[%s1053_s5 + $0x40] sm:$0xff] }
 0x18c   : > { %v436_v15 = vadd.f32 %v435_v11, %v434_v10  ;;  %v1023_v21 = vpop.eup %626  ;;  %v441_v25 = vsel %vm175_vm0, %v1017_v17, 0.0  ;;  %638 = vpow2.f32 %v424_v27  ;;  %v488_v27 = vld [vmem:[%s1053_s5 + $0x18] sm:$0xff] }
 0x18d   : > { %v629_v26 = vpop.eup %628  ;;  %v443_v29 = vsel %vm175_vm0, %v1023_v21, 0.0  ;;  %640 = vpow2.f32 %v426_v31 }
 0x18e   : > { %v438_v19 = vadd.f32 %v437_v16, %v436_v15  ;;  %v631_v30 = vpop.eup %630  ;;  %v445_v32 = vsel %vm175_vm0, %v629_v26, 0.0  ;;  %642 = vpow2.f32 %v428_v35 }
 0x18f   : > { %v633_v33 = vpop.eup %632  ;;  %v447_v37 = vsel %vm175_vm0, %v631_v30, 0.0 }
 0x190   : > { %v440_v24 = vadd.f32 %v439_v20, %v438_v19  ;;  %v635_v38 = vpop.eup %634  ;;  %v449_v41 = vsel %vm175_vm0, %v633_v33, 0.0 }
 0x191   : > { %v637_v43 = vpop.eup %636  ;;  %v451_v47 = vsel %vm175_vm0, %v635_v38, 0.0 }
 0x192   : > { %v442_v28 = vadd.f32 %v441_v25, %v440_v24  ;;  %v639_v50 = vpop.eup %638  ;;  %v453_v52 = vsel %vm175_vm0, %v637_v43, 0.0  ;;  %v492_v24 = vld [vmem:[%s1053_s5 + $0x38] sm:$0xff]  ;;  %v491_v25 = vld [vmem:[%s1053_s5 + $0x30] sm:$0xff] }
 0x193   : > { %v641_v53 = vpop.eup %640  ;;  %v455_v55 = vsel %vm175_vm0, %v639_v50, 0.0 }
 0x194   : > { %v444_v14 = vadd.f32 %v443_v29, %v442_v28  ;;  %v643_v59 = vpop.eup %642  ;;  %v457_v42 = vsel %vm175_vm0, %v641_v53, 0.0  ;;  %v487_v28 = vld [vmem:[%s1053_s5 + $0x10] sm:$0xff]  ;;  %v486_v29 = vld [vmem:[%s1053_s5 + $0x8] sm:$0xff] }
 0x195   : > { %v459_v56 = vsel %vm175_vm0, %v643_v59, 0.0 }
 0x196   : > { %v446_v36 = vadd.f32 %v445_v32, %v444_v14 }
 0x198   : > { %v448_v22 = vadd.f32 %v447_v37, %v446_v36 }
 0x19a   : > { %v450_v44 = vadd.f32 %v449_v41, %v448_v22 }
 0x19c   : > { %v452_v51 = vadd.f32 %v451_v47, %v450_v44 }
 0x19e   : > { %v454_v54 = vadd.f32 %v453_v52, %v452_v51 }
 0x1a0   : > { %v456_v39 = vadd.f32 %v455_v55, %v454_v54 }
 0x1a2   : > { %v458_v49 = vadd.f32 %v457_v42, %v456_v39 }
 0x1a4   : > { %v460_v34 = vadd.f32 %v459_v56, %v458_v49 }
 0x1a6   : > { %v461_v60 = vrot.slane %v460_v34, 4 }
 0x1a8   : > { %v462_v46 = vadd.f32 %v461_v60, %v460_v34 }
 0x1aa   : > { %v463_v62 = vrot.slane %v462_v46, 2 }
 0x1ac   : > { %v464_v1 = vadd.f32 %v463_v62, %v462_v46 }
 0x1ae   : > { %v465_v3 = vrot.slane %v464_v1, 1 }
 0x1b0   : > { %v466_v4 = vadd.f32 %v465_v3, %v464_v1 }
 0x1b2   : > { %644 = vrcp.f32 %v466_v4 }
 0x1b8   : > { %v645_v5 = vpop.eup %644 }
 0x1b9   : > { %v468_v6 = vmul.f32 %v645_v5, %v987_v40  ;;  %v476_v58 = vmul.f32 %v645_v5, %v629_v26  ;;  %v477_v8 = vmul.f32 %v645_v5, %v631_v30  ;;  %v478_v9 = vmul.f32 %v645_v5, %v633_v33  ;;  %v490_v26 = vld [vmem:[%s1053_s5 + $0x28] sm:$0xff]  ;;  %v485_v30 = vld [vmem:[%s1053_s5] sm:$0xff] }
 0x1ba   : > { %v479_v10 = vmul.f32 %v645_v5, %v635_v38  ;;  %v480_v11 = vmul.f32 %v645_v5, %v637_v43  ;;  %v481_v57 = vmul.f32 %v645_v5, %v639_v50  ;;  %v482_v13 = vmul.f32 %v645_v5, %v641_v53 }
 0x1bb   : > { %501 = vxpose.xlu1.b32.start [1/16] (narrow) %v468_v6, 8  ;;  %v483_v15 = vmul.f32 %v645_v5, %v643_v59  ;;  %v469_v16 = vmul.f32 %v645_v5, %v989_v61  ;;  %v470_v2 = vmul.f32 %v645_v5, %v995_v45  ;;  %v471_v18 = vmul.f32 %v645_v5, %v999_v48  ;;  %v500_v61 = vld [vmem:[%s1053_s5 + $0x78] sm:$0xff]  ;;  %v499_v45 = vld [vmem:[%s1053_s5 + $0x70] sm:$0xff]  ;;  %v498_v48 = vld [vmem:[%s1053_s5 + $0x68] sm:$0xff] }
 0x1bc   : > { %v472_v40 = vmul.f32 %v645_v5, %v1005_v7  ;;  %v473_v19 = vmul.f32 %v645_v5, %v1011_v12  ;;  %v474_v20 = vmul.f32 %v645_v5, %v1017_v17  ;;  %v475_v0 = vmul.f32 %v645_v5, %v1023_v21  ;;  %533 = vmatpush.msra.mxu0 %v500_v61  ;;  %v497_v7 = vld [vmem:[%s1053_s5 + $0x60] sm:$0xff]  ;;  %v496_v12 = vld [vmem:[%s1053_s5 + $0x58] sm:$0xff]  ;;  %v495_v17 = vld [vmem:[%s1053_s5 + $0x50] sm:$0xff] }
 0x1bd   : > { %v494_v21 = vld [vmem:[%s1053_s5 + $0x48] sm:$0xff] }
 0x1be   : > { %534 = vmatpush.msra.mxu0 %v499_v45 }
 0x1c0   : > { %535 = vmatpush.msra.mxu0 %v498_v48 }
 0x1c2   : > { %536 = vmatpush.msra.mxu0 %v497_v7 }
 0x1c3   : > { %502 = vxpose.xlu1.b32.cont [2/16] (narrow) %v469_v16, 8 }
 0x1c4   : > { %537 = vmatpush.msra.mxu0 %v496_v12 }
 0x1c6   : > { %538 = vmatpush.msra.mxu0 %v495_v17 }
 0x1c8   : > { %539 = vmatpush.msra.mxu0 %v494_v21 }
 0x1ca   : > { %540 = vmatpush.msra.mxu0 %v493_v23 }
 0x1cb   : > { %503 = vxpose.xlu1.b32.cont [3/16] (narrow) %v470_v2, 8 }
 0x1cc   : > { %541 = vmatpush.msra.mxu0 %v492_v24 }
 0x1ce   : > { %542 = vmatpush.msra.mxu0 %v491_v25 }
 0x1d0   : > { %543 = vmatpush.msra.mxu0 %v490_v26 }
 0x1d2   : > { %544 = vmatpush.msra.mxu0 %v489_v63 }
 0x1d3   : > { %504 = vxpose.xlu1.b32.cont [4/16] (narrow) %v471_v18, 8 }
 0x1d4   : > { %545 = vmatpush.msra.mxu0 %v488_v27 }
 0x1d6   : > { %546 = vmatpush.msra.mxu0 %v487_v28 }
 0x1d8   : > { %547 = vmatpush.msra.mxu0 %v486_v29 }
 0x1da   : > { %548 = vmatpush.msra.mxu0 %v485_v30 }
 0x1db   : > { %505 = vxpose.xlu1.b32.cont [5/16] (narrow) %v472_v40, 8 }
 0x1e3   : > { %506 = vxpose.xlu1.b32.cont [6/16] (narrow) %v473_v19, 8 }
 0x1eb   : > { %507 = vxpose.xlu1.b32.cont [7/16] (narrow) %v474_v20, 8 }
 0x1f3   : > { %508 = vxpose.xlu1.b32.cont [8/16] (narrow) %v475_v0, 8 }
 0x1fb   : > { %509 = vxpose.xlu1.b32.cont [9/16] (narrow) %v476_v58, 8 }
 0x203   : > { %510 = vxpose.xlu1.b32.cont [10/16] (narrow) %v477_v8, 8 }
 0x20b   : > { %511 = vxpose.xlu1.b32.cont [11/16] (narrow) %v478_v9, 8 }
 0x213   : > { %512 = vxpose.xlu1.b32.cont [12/16] (narrow) %v479_v10, 8 }
 0x21b   : > { %513 = vxpose.xlu1.b32.cont [13/16] (narrow) %v480_v11, 8 }
 0x223   : > { %514 = vxpose.xlu1.b32.cont [14/16] (narrow) %v481_v57, 8 }
 0x22b   : > { %515 = vxpose.xlu1.b32.cont [15/16] (narrow) %v482_v13, 8 }
 0x233   : > { %516 = vxpose.xlu1.b32.end [16/16] (narrow) %v483_v15, 8 }
 0x25f   : > { %v517_v31 = vpop.trf.xlu1 }
 0x260   : > { %549 = vmatmul.f32.vlgmr.msra.gmra.mxu0 %v517_v31 }
 0x2da   :  { %212 = sbr.rel (!%p210_p0) target bundleno = 199 (0xc7), region = 47 }
 0x2dd   : > { %v550_v14 = vpop.f32.mrf.mxu0 }
 0x2de   : > { %555 = vst [vmem:[%s554_s7] sm:$0xff] %v550_v14 }
 0x2df   :  { %568 = dma.vmem_to_hbm [thread:$0]  %s561_s12, 256, %s563_s10, [#allocation5], %s709_s13, %s709_s13, %s710_s14  }
 0x2e0   :  { %700 = dma.done.wait [#allocation5], 256  }
 0x2e1   :  { %701 = vsyncadd [#allocation5], 4294967040 }
 0x2e2   :  { %573 = vsyncpa [#allocation4], 1 }
 0x2e3   :  { %574 = vsyncpa [#allocation5], 1 }

</bundles_post_ra>
